<compile_context>
chip_gen: v6e
topology: v6e:2x2x1
jax: 0.10.0
libtpu: 0.0.40
codegen_flags: <defaults>
</compile_context>

<pallas_src>
import random
from functools import partial

import jax
import jax.numpy as jnp
from jax import lax
from jax.experimental import pallas as pl
from jax.experimental.pallas import tpu as pltpu

_LANE_TILE = 128  # TPU lane width: keep the T (last) block dim a multiple of this.


def _plan_tiles(T, max_mask_len_T):
    """Static tiling plan: (block_t, nb) = T-block size and #tiles a mask can touch."""
    if T % _LANE_TILE == 0 and T > _LANE_TILE:
        block_t = _LANE_TILE
    else:
        block_t = T  # small / ragged T: one full block (correct, just untiled)
    num_blocks = T // block_t
    max_span = max(max_mask_len_T - 1, 1)  # mask length = randrange(0, max) => < max
    nb = min(num_blocks, (max_span + block_t - 2) // block_t + 1)
    return block_t, nb


def _time_mask_kernel(s_ref, fill_ref, x_ref, o_ref, *, block_t):
    # s_ref   : scalar-prefetched SMEM int32 (3,) = [start_tile, t_begin, t_end)
    # fill_ref: (C, 1, 1) per-channel fill value (channel mean, or 0)
    # x_ref/o_ref: one (C, F, block_t) slab of the spectrogram (output aliases input)
    x = x_ref[...]
    base = (s_ref[0] + pl.program_id(0)) * block_t         # global column of lane 0
    col = lax.broadcasted_iota(jnp.int32, x.shape, dimension=2) + base
    mask = (col >= s_ref[1]) & (col < s_ref[2])
    o_ref[...] = jnp.where(mask, fill_ref[...], x)


@partial(jax.jit,
         static_argnames=("block_t", "nb", "replace_with_zero"),
         donate_argnums=(0,))
def _apply_time_mask(x, t_begin, t_end, *, block_t, nb, replace_with_zero):
    C, F, T = x.shape
    num_blocks = T // block_t

    # Per-channel fill value, computed once outside the masking pass.
    if replace_with_zero:
        fill = jnp.zeros((C, 1, 1), dtype=x.dtype)
    else:
        fill = jnp.mean(x, axis=(1, 2), dtype=jnp.float32).astype(x.dtype)
        fill = fill.reshape(C, 1, 1)

    t_begin = jnp.asarray(t_begin, jnp.int32)
    t_end = jnp.asarray(t_end, jnp.int32)
    start_tile = jnp.clip(t_begin // block_t, 0, num_blocks - nb).astype(jnp.int32)
    scalars = jnp.stack([start_tile, t_begin, t_end])

    grid_spec = pltpu.PrefetchScalarGridSpec(
        num_scalar_prefetch=1,
        grid=(nb,),
        in_specs=[
            pl.BlockSpec((C, 1, 1), lambda t, s: (0, 0, 0)),               # fill
            pl.BlockSpec((C, F, block_t), lambda t, s: (0, 0, s[0] + t)),  # x tile
        ],
        out_specs=pl.BlockSpec((C, F, block_t), lambda t, s: (0, 0, s[0] + t)),
    )
    return pl.pallas_call(
        partial(_time_mask_kernel, block_t=block_t),
        out_shape=jax.ShapeDtypeStruct((C, F, T), x.dtype),
        grid_spec=grid_spec,
        # x is input #2 (after the scalar-prefetch array and fill); aliasing it to
        # output 0 means only the visited lane tiles are ever written back.
        input_output_aliases={2: 0},
        compiler_params=pltpu.CompilerParams(
            dimension_semantics=("arbitrary",)),
    )(scalars, fill, x)


def time_mask(mel_spectro, max_mask_len_T=20, num_masks=1,
              replace_with_zero=False, rng=None):
    """JAX/Pallas equivalent of TimeMask.forward.

    The PyTorch module mutates in place; here the input buffer is donated to
    the kernel and a new array is returned. Mask positions come from the
    host-side `random` module, exactly like the original module.
    """
    rng = rng if rng is not None else random
    x = jnp.asarray(mel_spectro)
    T = x.shape[2]
    block_t, nb = _plan_tiles(T, max_mask_len_T)
    for _ in range(num_masks):
        t_mask_len = rng.randrange(0, max_mask_len_T)
        if t_mask_len >= T:
            return x
        t_mask_begin = rng.randrange(0, T - t_mask_len)
        if t_mask_begin == t_mask_begin + t_mask_len:   # zero-length mask
            return x
        t_mask_end = rng.randrange(t_mask_begin, t_mask_begin + t_mask_len)
        x = _apply_time_mask(x, t_mask_begin, t_mask_end,
                             block_t=block_t, nb=nb,
                             replace_with_zero=replace_with_zero)
    return x


if __name__ == "__main__":
    key = jax.random.PRNGKey(0)
    C, F, T = 4, 16, 512          # (channels, freq_bins, time_steps)
    x = jax.random.normal(key, (C, F, T), dtype=jnp.float32)

    # --- direct kernel check against a pure-jnp reference (mean fill) -------
    t_begin, t_end = 130, 145     # touches lane tile 1; tiles 0 and 3 stay untouched
    block_t, nb = _plan_tiles(T, max_mask_len_T=20)
    means = jnp.mean(x, axis=(1, 2), dtype=jnp.float32).astype(x.dtype)[:, None, None]
    cols = jnp.arange(T)[None, None, :]
    expected = jax.block_until_ready(
        jnp.where((cols >= t_begin) & (cols < t_end), means, x))

    x_work = jax.block_until_ready(x + 0.0)   # private copy: the kernel donates its input
    out = _apply_time_mask(x_work, t_begin, t_end,
                           block_t=block_t, nb=nb, replace_with_zero=False)
    out = jax.block_until_ready(out)
    assert out.shape == (C, F, T) and out.dtype == x.dtype
    assert bool(jnp.allclose(out, expected, rtol=1e-6, atol=1e-6))

    # --- full module-equivalent path (host RNG, zero fill, 2 masks) ---------
    out2 = time_mask(x + 0.0, max_mask_len_T=20, num_masks=2,
                     replace_with_zero=True, rng=random.Random(0))
    out2 = jax.block_until_ready(out2)
    assert out2.shape == (C, F, T) and out2.dtype == x.dtype

    print("KERNEL_OK")
</pallas_src>

<mosaic_0001>
module attributes {stable_mosaic.version = 11 : i64} {
  func.func @_time_mask_kernel(%arg0: i32, %arg1: memref<3xi32, #tpu.memory_space<smem>>, %arg2: memref<4x1x1xf32, #tpu.memory_space<vmem>>, %arg3: memref<4x16x128xf32, #tpu.memory_space<vmem>>, %arg4: memref<4x16x128xf32, #tpu.memory_space<vmem>>) attributes {dimension_semantics = [#tpu.dimension_semantics<arbitrary>], iteration_bounds = array<i64: 2>, scalar_prefetch = 1 : i64, scratch_operands = 0 : i64, tpu.core_type = #tpu.core_type<tc>, window_params = [{pipeline_mode = #tpu.pipeline_mode<synchronous>, transform_indices = @transform_0, window_bounds = array<i64: 4, 1, 1>}, {transform_indices = @transform_1, window_bounds = array<i64: 4, 16, 128>}, {transform_indices = @transform_2, window_bounds = array<i64: 4, 16, 128>}]} {
    %c0 = arith.constant 0 : index
    %c0_0 = arith.constant 0 : index
    %c0_1 = arith.constant 0 : index
    %0 = vector.load %arg3[%c0, %c0_0, %c0_1] : memref<4x16x128xf32, #tpu.memory_space<vmem>>, vector<4x16x128xf32>
    %c0_2 = arith.constant 0 : index
    %1 = memref.load %arg1[%c0_2] : memref<3xi32, #tpu.memory_space<smem>>
    %2 = arith.addi %1, %arg0 : i32
    %c128_i32 = arith.constant 128 : i32
    %3 = arith.muli %2, %c128_i32 : i32
    %4 = tpu.iota {dimensions = array<i32: 2>} : vector<4x16x128xi32>
    %5 = vector.broadcast %3 : i32 to vector<4x16x128xi32>
    %6 = arith.addi %4, %5 : vector<4x16x128xi32>
    %c1 = arith.constant 1 : index
    %7 = memref.load %arg1[%c1] : memref<3xi32, #tpu.memory_space<smem>>
    %8 = vector.broadcast %7 : i32 to vector<4x16x128xi32>
    %9 = arith.cmpi sge, %6, %8 : vector<4x16x128xi32>
    %c2 = arith.constant 2 : index
    %10 = memref.load %arg1[%c2] : memref<3xi32, #tpu.memory_space<smem>>
    %11 = vector.broadcast %10 : i32 to vector<4x16x128xi32>
    %12 = arith.cmpi slt, %6, %11 : vector<4x16x128xi32>
    %13 = arith.andi %9, %12 : vector<4x16x128xi1>
    %c0_3 = arith.constant 0 : index
    %c0_4 = arith.constant 0 : index
    %c0_5 = arith.constant 0 : index
    %14 = vector.load %arg2[%c0_3, %c0_4, %c0_5] : memref<4x1x1xf32, #tpu.memory_space<vmem>>, vector<4x1x1xf32>
    %15 = vector.shape_cast %14 : vector<4x1x1xf32> to vector<4x1x1xf32>
    %16 = vector.broadcast %15 : vector<4x1x1xf32> to vector<4x16x128xf32>
    %17 = arith.select %13, %16, %0 : vector<4x16x128xi1>, vector<4x16x128xf32>
    %c0_6 = arith.constant 0 : index
    %c0_7 = arith.constant 0 : index
    %c0_8 = arith.constant 0 : index
    %18 = vector.load %arg4[%c0_6, %c0_7, %c0_8] : memref<4x16x128xf32, #tpu.memory_space<vmem>>, vector<4x16x128xf32>
    tpu.vector_store %arg4[%c0_6, %c0_7, %c0_8], %17 {strides = array<i32>} : memref<4x16x128xf32, #tpu.memory_space<vmem>>, vector<4x16x128xf32>,
    return
  }
  func.func @transform_0(%arg0: i32, %arg1: memref<3xi32, #tpu.memory_space<smem>>) -> (i32, i32, i32) {
    %c0_i32 = arith.constant 0 : i32
    %c0_i32_0 = arith.constant 0 : i32
    %c0_i32_1 = arith.constant 0 : i32
    %c0_i32_2 = arith.constant 0 : i32
    return %c0_i32, %c0_i32_0, %c0_i32_1 : i32, i32, i32
  }
  func.func @transform_1(%arg0: i32, %arg1: memref<3xi32, #tpu.memory_space<smem>>) -> (i32, i32, i32) {
    %c0 = arith.constant 0 : index
    %0 = memref.load %arg1[%c0] : memref<3xi32, #tpu.memory_space<smem>>
    %1 = arith.addi %0, %arg0 : i32
    %c0_i32 = arith.constant 0 : i32
    %c0_i32_0 = arith.constant 0 : i32
    %c0_i32_1 = arith.constant 0 : i32
    return %c0_i32, %c0_i32_0, %1 : i32, i32, i32
  }
  func.func @transform_2(%arg0: i32, %arg1: memref<3xi32, #tpu.memory_space<smem>>) -> (i32, i32, i32) {
    %c0 = arith.constant 0 : index
    %0 = memref.load %arg1[%c0] : memref<3xi32, #tpu.memory_space<smem>>
    %1 = arith.addi %0, %arg0 : i32
    %c0_i32 = arith.constant 0 : i32
    %c0_i32_0 = arith.constant 0 : i32
    %c0_i32_1 = arith.constant 0 : i32
    return %c0_i32, %c0_i32_0, %1 : i32, i32, i32
  }
}

</mosaic_0001>

<bundles_post_ra>
// kernel: _apply_time_mask.1
= control target key start
LH: loop header
LB: loop body
LE: loop exit
PB: predicated region body
PF: predicated region fallthrough
CT: control target
= control target key end

     0   :  { %s845_s0 = inlined_call_operand.vmem [shape: s32[3], index: 0, kind: input, shape index: {}]   ;;  %s846_s1 = inlined_call_operand.vmem [shape: f32[4,1,1], index: 1, kind: input, shape index: {}]   ;;  %s847_s2 = inlined_call_operand.hbm [shape: f32[4,16,512], index: 2, kind: input, shape index: {}, may-alias: {2,3}]   ;;  %s848_s3 = inlined_call_operand.hbm [shape: f32[4,16,512], index: 3, kind: output, shape index: {}, may-alias: {2,3}]  }
   0x1   :  { %s8_s14 = sshll.u32 %s845_s0, 4  ;;  %s9_s14 = int_to_ptr.vmem [resolvable:$true] %s8_s14 }
   0x2   :  { %s449_s15 = scalar_lea.vmem %s9_s14, 16  ;;  %p454_p1 = scmp.lt.s32.totalorder %s9_s14, %s9_s14 }
   0x3   :  { %p450_p0 = scmp.ne.s32.totalorder %s9_s14, %s449_s15  ;;  %p455_p2 = scmp.lt.s32.totalorder %s449_s15, %s449_s15 }
   0x5   :  { %p456_p3 = por %p455_p2, %p454_p1 }
   0x7   :  { %p457_p4 = pnand %p456_p3, %p450_p0 }
   0x9   :  { %460 = shalt.err (!%p457_p4)  }
   0xa   :  { %s581_s16 = smov [#allocation3]  }
   0xb   :  { %11 = dma.vmem_to_smem %s9_s14, 16, %s581_s16, [#allocation2] }
   0xc   :  { %543 = dma.done.wait [#allocation2], 16 }
   0xd   :  { %544 = vsyncadd [#allocation2], 4294967280 }
   0xe   :  { %13 = sfence }
   0xf   :  { %14 = vsyncpa [#allocation5], 0 }
  0x10   :  { %16 = vsyncpa [#allocation5 + $0x1], 0 }
  0x11   :  { %17 = vsyncpa [#allocation6], 0 }
  0x12   :  { %19 = vsyncpa [#allocation6 + $0x1], 0  ;;  %s614_s17 = smov 0   ;;  %s616_s0 = smov 0  }
  0x13   :  { %s618_s18 = smov 0   ;;  %s620_s19 = smov 0  }
  0x14   :  { %s622_s20 = smov 0   ;;  %s624_s21 = smov 0  }
  0x15   :  { %s626_s22 = smov 0  }
  0x16 LB: > { %s648_s23 = sadd.s32 4294967295, %s579_s22   ;;  %s350_s24 = sadd.s32 4294967294, %s579_s22   ;;  %s579_s22 = sphi %s626_s22, %s869_s22   ;;  %s575_s21 = sphi %s624_s21, %s868_s21   ;;  %s571_s20 = sphi %s622_s20, %s867_s20   ;;  %s567_s19 = sphi %s620_s19, %s866_s19   ;;  %s563_s18 = sphi %s618_s18, %s865_s18   ;;  %s559_s0 = sphi %s616_s0, %s864_s0   ;;  %s555_s17 = sphi %s614_s17, %s863_s17  }
  0x17   : > { %s652_s25 = sadd.s32 1, %s579_s22   ;;  %s50_s26 = sld [smem:[#allocation3]] }
  0x18   : > { %s57_s27 = sadd.s32 1, %s575_s21  ;;  %p64_p5 = scmp.ne.s32.totalorder %s575_s21, %s571_s20 }
  0x19   : > { %p65_p6 = scmp.eq.s32.totalorder %s579_s22, 0  ;;  %p70_p7 = scmp.ne.s32.totalorder %s571_s20, %s567_s19 }
  0x1a   : > { %p71_p8 = scmp.eq.s32.totalorder %s648_s23, 0  ;;  %s87_s28 = sadd.s32 1, %s563_s18 }
  0x1b   : > { %p661_p9 = por %p65_p6, %p64_p5  ;;  %p97_p10 = scmp.ne.s32.totalorder %s563_s18, %s559_s0 }
  0x1c   : > { %p667_p11 = por %p71_p8, %p70_p7  ;;  %p98_p12 = scmp.eq.s32.totalorder %s648_s23, 1 }
  0x1d   : > { %s51_s4 = sadd.s32 %s579_s22, %s50_s26  ;;  %s53_s5 = sadd.s32 %s50_s26, %s652_s25 }
  0x1e   : > { %s852_s30 = scalar_select %p667_p11, 1, 0 }
  0x1f   : > { %s54_s6 = ssub.s32 %s51_s4, %s53_s5  ;;  %p674_p13 = por %p98_p12, %p97_p10 }
  0x20   : > { %p55_p0 = scmp.eq.s32.totalorder %s54_s6, 0  ;;  %p103_p1 = scmp.ne.s32.totalorder %s559_s0, %s555_s17 }
  0x21   : > { %s853_s7 = scalar_select %p674_p13, 1, 0 }
  0x22   : > { %p104_p2 = scmp.eq.s32.totalorder %s350_s24, 1  ;;  %p381_p5 = scmp.lt.s32.totalorder %s579_s22, 2 }
  0x23   : > { %s682_s8 = scalar_select %p55_p0, %s575_s21, %s57_s27  }
  0x24   : > { %s685_s9 = scalar_select %p55_p0, %s563_s18, %s87_s28  }
  0x25   : > { %p687_p4 = por %p104_p2, %p103_p1  ;;  %s127_s11 = sand.u32 1, %s575_s21  }
  0x26   : > { %s354_s12 = sshll.u32 %s51_s4, 7  ;;  %s353_s13 = sshll.u32 %s127_s11, 6 }
  0x27   : > { %s854_s10 = scalar_select %p687_p4, 1, 0 }
  0x28   : > { %s696_s16 = scalar_lea.hbm %s847_s2, %s354_s12  ;;  %s131_s19 = scalar_lea.vmem [#allocation4], %s353_s13 }
  0x29   : > { %s139_s24 = sshll.u32 %s131_s19, 4  ;;  %p700_p6 = pnand %p381_p5, %p661_p9  ;;  %s704_s24 = int_to_ptr.vmem [resolvable:$true] %s139_s24 }
  0x2a   : > { %s707_s27 = scalar_lea.sflag [#allocation5], %s127_s11  ;;  %s461_s28 = scalar_lea.hbm %s696_s16, 1024 }
  0x2b   : > { %p462_p8 = scmp.ne.s32.totalorder %s696_s16, %s461_s28  ;;  %p463_p10 = pneg %p700_p6 }
  0x2c   : > { %s466_s29 = scalar_lea.hbm %s847_s2, 4096  ;;  %p467_p9 = scmp.lt.s32.totalorder %s696_s16, %s847_s2 }
  0x2d   : > { %p464_p12 = pnand %p463_p10, %p462_p8  ;;  %p468_p1 = scmp.lt.s32.totalorder %s466_s29, %s461_s28 }
  0x2f   : > { %p465_p0 = pneg %p464_p12  ;;  %p469_p2 = por %p468_p1, %p467_p9 }
  0x31   : > { %p470_p5 = pnand %p469_p2, %p465_p0 }
  0x33   : > { %473 = shalt.err (!%p470_p5)
}
  0x34   : > { %s474_s11 = scalar_lea.vmem %s704_s24, 1024  ;;  %s582_s13 = smov [#allocation4]  }
  0x35   : > { %p475_p3 = scmp.ne.s32.totalorder %s704_s24, %s474_s11  ;;  %s479_s14 = sshll.u32 %s582_s13, 4  ;;  %s480_s14 = int_to_ptr.vmem [resolvable:$false] %s479_s14 }
  0x36   : > { %s481_s15 = scalar_lea.vmem %s480_s14, 2048  ;;  %p482_p12 = scmp.lt.s32.totalorder %s704_s24, %s480_s14 }
  0x37   : > { %p477_p7 = pnand %p475_p3, %p463_p10  ;;  %p483_p4 = scmp.lt.s32.totalorder %s481_s15, %s474_s11 }
  0x39   : > { %p478_p8 = pneg %p477_p7  ;;  %p484_p13 = por %p483_p4, %p482_p12 }
  0x3b   : > { %p485_p11 = pnand %p484_p13, %p478_p8 }
  0x3d   : > { %488 = shalt.err (!%p485_p11)
}
  0x3e   : > { %s583_s19 = smov 512   ;;  %s584_s28 = smov 128  }
  0x3f   : > { %s585_s4 = smov 8   ;;  %p147_p3 = scmp.lt.s32.totalorder %s579_s22, 3 }
  0x40   : > { %376 = dma.hbm_to_vmem [thread:$0]  (!%p700_p6), %s696_s16, 1024, %s704_s24, %s707_s27, %s583_s19, %s584_s28, %s585_s4  }
  0x41   : > { %p856_p7 = scmp.ge.s32.totalorder %s579_s22, 1 }
  0x43   : > { %p148_p10 = pnand %p856_p7, %p147_p3 }
  0x44   : > { %s153_s5 = sand.u32 (!%p148_p10), 1, %s571_s20   ;;  %p857_p11 = scmp.ne.s32.totalorder (!%p148_p10), %s852_s30, 0 }
  0x45   : > { %151 = sbr.rel (%p148_p10) target bundleno = 222 (0xde), region = 28  ;;  %s356_s29 = sshll.u32 (!%p148_p10), %s153_s5, 6 }
  0x46   : > { %s154_s6 = scalar_lea.sflag (!%p148_p10), [#allocation5], %s153_s5  ;;  %s732_s12 = scalar_lea.vmem (!%p148_p10), [#allocation4], %s356_s29 }
  0x4a   : > { %546 = dma.done.wait (%p857_p11), %s154_s6, 1024  }
  0x4b   : > { %548 = vsyncadd (%p857_p11), %s154_s6, 4294966272  ;;  %v586_v0 = vmov 0   ;;  %v363_v1 = vld [vmem:[%s846_s1 + $0x2] ss:$0 sm:$0xff]  ;;  %v361_v2 = vld [vmem:[%s846_s1] ss:$0 sm:$0xff]  ;;  %v193_v5 = vlaneseq }
  0x4c   : > { %448 = vset.pattern.permute.xlu1 %v586_v0  ;;  %447 = vset.pattern.permute.xlu0 %v586_v0  ;;  %v364_v3 = vld [vmem:[%s846_s1 + $0x3] ss:$0 sm:$0xff]  ;;  %v362_v4 = vld [vmem:[%s846_s1 + $0x1] ss:$0 sm:$0xff]  ;;  %s190_s15 = sld [smem:[#allocation3]]  ;;  %s175_s29 = sand.u32 1, %s559_s0  }
  0x4d   : > { %237 = vperm.xlu1 %448, %v363_v1   ;;  %229 = vperm.xlu0 %447, %v361_v2   ;;  %s359_s28 = sld [smem:[#allocation3 + $0x1]]  ;;  %v194_v6 = vand.u32 127, %v193_v5  ;;  %s357_s6 = sshll.u32 %s175_s29, 6  ;;  %v186_v11 = vld [vmem:[%s732_s12 + $0x20] sm:$0xff]  ;;  %v187_v12 = vld [vmem:[%s732_s12 + $0x28] sm:$0xff]  ;;  %v188_v22 = vld [vmem:[%s732_s12 + $0x30] sm:$0xff] }
  0x4e   : > { %s360_s4 = sld [smem:[#allocation3 + $0x2]]  ;;  %v182_v14 = vld [vmem:[%s732_s12] sm:$0xff]  ;;  %v183_v15 = vld [vmem:[%s732_s12 + $0x8] sm:$0xff]  ;;  %v189_v23 = vld [vmem:[%s732_s12 + $0x38] sm:$0xff]  ;;  %p860_p4 = scmp.ne.s32.totalorder %s853_s7, 0 }
  0x4f   : > { %v184_v24 = vld [vmem:[%s732_s12 + $0x10] sm:$0xff]  ;;  %v185_v25 = vld [vmem:[%s732_s12 + $0x18] sm:$0xff]  ;;  %s795_s12 = scalar_lea.sflag [#allocation6], %s175_s29  ;;  %s587_s13 = smov [#allocation7]  }
  0x50   : > { %s493_s30 = sshll.u32 %s587_s13, 4  ;;  %s494_s30 = int_to_ptr.vmem [resolvable:$false] %s493_s30 }
  0x51   : > { %241 = vperm.xlu1 %448, %v364_v3   ;;  %233 = vperm.xlu0 %447, %v362_v4   ;;  %s495_s14 = scalar_lea.vmem %s494_s30, 2048 }
  0x52   : > { %s191_s19 = sadd.s32 %s648_s23, %s190_s15  ;;  %s177_s23 = scalar_lea.vmem [#allocation7], %s357_s6 }
  0x53   : > { %s751_s5 = sshll.u32 %s191_s19, 7  ;;  %v198_v9 = vstv %s359_s28  ;;  %s275_s16 = sshll.u32 %s177_s23, 4  ;;  %s774_s16 = int_to_ptr.vmem [resolvable:$true] %s275_s16 }
  0x54   : > { %v195_v7 = vstv %s751_s5  ;;  %v201_v10 = vstv %s360_s4  ;;  %s783_s27 = scalar_lea.hbm %s848_s3, %s751_s5  ;;  %s489_s11 = scalar_lea.vmem %s774_s16, 1024 }
  0x55   : > { %v196_v8 = vadd.s32 %v195_v7, %v194_v6  ;;  %p490_p13 = scmp.ne.s32.totalorder %s774_s16, %s489_s11  ;;  %p496_p9 = scmp.lt.s32.totalorder %s774_s16, %s494_s30 }
  0x56   : > { %p497_p1 = scmp.lt.s32.totalorder %s495_s14, %s489_s11 }
  0x57   : > { %vm199_vm0 = vcmp.ge.s32.totalorder %v196_v8, %v198_v9  ;;  %vm202_vm1 = vcmp.lt.s32.totalorder %v196_v8, %v201_v10  ;;  %p491_p6 = pnand %p490_p13, %p860_p4 }
  0x58   : > { %vm759_vm2 = vmand %vm199_vm0, %vm202_vm1  ;;  %p498_p2 = por %p497_p1, %p496_p9 }
  0x59   : > { %p492_p0 = pneg %p491_p6 }
  0x5b   : > { %p499_p5 = pnand %p498_p2, %p492_p0 }
  0xc8   : > { %v238_v16 = vpop.permute.xlu1 %237  ;;  %v230_v17 = vpop.permute.xlu0 %229 }
  0xc9   : > { %v248_v18 = vsel %vm759_vm2, %v238_v16, %v186_v11  ;;  %v249_v19 = vsel %vm759_vm2, %v238_v16, %v187_v12  ;;  %v244_v20 = vsel %vm759_vm2, %v230_v17, %v182_v14  ;;  %v245_v21 = vsel %vm759_vm2, %v230_v17, %v183_v15 }
  0xca   : > { %256 = vst [vmem:[%s177_s23 + $0x20] sm:$0xff] %v248_v18  ;;  %257 = vst [vmem:[%s177_s23 + $0x28] sm:$0xff] %v249_v19 }
  0xcb   : > { %252 = vst [vmem:[%s177_s23] sm:$0xff] %v244_v20  ;;  %253 = vst [vmem:[%s177_s23 + $0x8] sm:$0xff] %v245_v21 }
  0xcc   : > { %v242_v26 = vpop.permute.xlu1 %241  ;;  %v234_v27 = vpop.permute.xlu0 %233 }
  0xcd   : > { %v250_v28 = vsel %vm759_vm2, %v242_v26, %v188_v22  ;;  %v251_v29 = vsel %vm759_vm2, %v242_v26, %v189_v23  ;;  %v246_v30 = vsel %vm759_vm2, %v234_v27, %v184_v24  ;;  %v247_v31 = vsel %vm759_vm2, %v234_v27, %v185_v25 }
  0xce   : > { %258 = vst [vmem:[%s177_s23 + $0x30] sm:$0xff] %v250_v28  ;;  %259 = vst [vmem:[%s177_s23 + $0x38] sm:$0xff] %v251_v29 }
  0xcf   : > { %254 = vst [vmem:[%s177_s23 + $0x10] sm:$0xff] %v246_v30  ;;  %255 = vst [vmem:[%s177_s23 + $0x18] sm:$0xff] %v247_v31 }
  0xd0   : > { %502 = shalt.err (!%p499_p5)
}
  0xd1   : > { %s503_s15 = scalar_lea.hbm %s783_s27, 1024  ;;  %s507_s4 = scalar_lea.hbm %s848_s3, 4096 }
  0xd2   : > { %p504_p8 = scmp.ne.s32.totalorder %s783_s27, %s503_s15  ;;  %p508_p7 = scmp.lt.s32.totalorder %s783_s27, %s848_s3 }
  0xd3   : > { %p509_p10 = scmp.lt.s32.totalorder %s507_s4, %s503_s15 }
  0xd4   : > { %p505_p12 = pnand %p504_p8, %p860_p4 }
  0xd5   : > { %p510_p11 = por %p509_p10, %p508_p7 }
  0xd6   : > { %p506_p3 = pneg %p505_p12 }
  0xd8   : > { %p511_p13 = pnand %p510_p11, %p506_p3 }
  0xda   : > { %514 = shalt.err (!%p511_p13)
}
  0xdb   : > { %s588_s6 = smov 128   ;;  %s589_s23 = smov 512  }
  0xdc   : > { %s590_s24 = smov 8  }
  0xdd   : > { %371 = dma.vmem_to_hbm [thread:$0]  (%p860_p4), %s774_s16, 1024, %s783_s27, %s795_s12, %s588_s6, %s589_s23, %s590_s24  }
  0xde PF: > { %s290_s26 = sand.u32 1, %s555_s17   ;;  %p861_p6 = scmp.ne.s32.totalorder %s854_s10, 0 }
  0xdf   : > { %p862_p0 = scmp.ge.s32.totalorder %s579_s22, 2  ;;  %s291_s11 = scalar_lea.sflag [#allocation6], %s290_s26 }
  0xe1   : > { %p378_p9 = pnand %p862_p0, %p861_p6 }
  0xe3   : > { %p379_p1 = pneg %p378_p9 }
  0xe5   : > { %550 = dma.done.wait (%p379_p1), %s291_s11, 1024  }
  0xe6   : > { %552 = vsyncadd (%p379_p1), %s291_s11, 4294966272  ;;  %p22_p4 = scmp.ge.s32.totalorder %s652_s25, 4   ;;  %s863_s17 = smov %s559_s0 }
  0xe7   : > { %s864_s0 = smov %s563_s18  ;;  %s865_s18 = smov %s685_s9 }
  0xe8   : > { %s866_s19 = smov %s571_s20  ;;  %s867_s20 = smov %s575_s21 }
  0xe9   : > { %s868_s21 = smov %s682_s8  ;;  %s869_s22 = smov %s652_s25 }
  0xea   :  { %24 = sbr.rel (!%p22_p4) target bundleno = 22 (0x16), region = 73 }
  0xef   :  { %296 = vsyncpa [#allocation5], 1 }
  0xf0   :  { %298 = vsyncpa [#allocation5 + $0x1], 1 }
  0xf1   :  { %299 = vsyncpa [#allocation6], 1 }
  0xf2   :  { %301 = vsyncpa [#allocation6 + $0x1], 1 }

</bundles_post_ra>
